<compile_context>
chip_gen: v7x
topology: tpu7x:2x2x1
jax: 0.10.0
libtpu: 0.0.40
codegen_flags: <defaults>
</compile_context>

<pallas_src>
import functools

import jax
import jax.numpy as jnp
from jax.experimental import pallas as pl
from jax.experimental.pallas import tpu as pltpu


def _round_up(n, m):
    return ((n + m - 1) // m) * m


# ---------------------------------------------------------------------------
# Kernel
# ---------------------------------------------------------------------------
def _encoder_kernel(x_ref, w1_ref, b1_ref, wh_ref, bh_ref, out_ref):
    # Two MXU matmuls with f32 accumulation; bias add + relu kept in f32
    # (v5e has no bf16 VALU; elementwise f32 is free next to the MXU).
    # Padded weight rows/cols are zero, so padded lanes stay zero and are
    # sliced off in the wrapper.
    x = x_ref[...]
    h = jnp.dot(x, w1_ref[...], preferred_element_type=jnp.float32) + b1_ref[...]
    h = jnp.maximum(h, 0.0)  # F.relu
    out = (jnp.dot(h.astype(wh_ref.dtype), wh_ref[...],
                   preferred_element_type=jnp.float32) + bh_ref[...])
    out_ref[...] = out.astype(out_ref.dtype)


# ---------------------------------------------------------------------------
# One-time parameter prep (transpose, fuse heads, pad, cast)
# ---------------------------------------------------------------------------
def prepare_params(params, dtype=jnp.bfloat16):
    """Transpose to [in, out], fuse mu/logvar into one [dim_h, 2*dim_z] head,
    pad every contraction/output dim to a multiple of 128 with zeros, and cast
    the matmul operands to `dtype` (bf16 default: full MXU rate + half the HBM
    bytes).  Biases stay f32.  Call once; reuse the result across forwards."""
    w_lin = jnp.asarray(params["w_lin"])
    dim_h, dim_x = w_lin.shape
    dim_z = params["w_mu"].shape[0]

    dim_x_pad = _round_up(dim_x, 128)
    dim_h_pad = _round_up(dim_h, 128)
    dout = 2 * dim_z
    dout_pad = _round_up(dout, 128)

    w1 = jnp.zeros((dim_x_pad, dim_h_pad), dtype)
    w1 = w1.at[:dim_x, :dim_h].set(w_lin.T.astype(dtype))
    b1 = jnp.zeros((1, dim_h_pad), jnp.float32)
    b1 = b1.at[0, :dim_h].set(params["b_lin"].astype(jnp.float32))

    wh = jnp.zeros((dim_h_pad, dout_pad), dtype)
    wh = wh.at[:dim_h, :dim_z].set(params["w_mu"].T.astype(dtype))
    wh = wh.at[:dim_h, dim_z:dout].set(params["w_logvar"].T.astype(dtype))
    bh = jnp.zeros((1, dout_pad), jnp.float32)
    bh = bh.at[0, :dim_z].set(params["b_mu"].astype(jnp.float32))
    bh = bh.at[0, dim_z:dout].set(params["b_logvar"].astype(jnp.float32))

    return {"w1": w1, "b1": b1, "wh": wh, "bh": bh, "dim_z": dim_z}


# ---------------------------------------------------------------------------
# Tile selection (trace-time Python; all shapes are static)
# ---------------------------------------------------------------------------
_VMEM_BUDGET = 44 * 1024 * 1024   # safe under v7x's 64 MiB physical VMEM
# TODO(synk): on v5e/v6e (128 MiB VMEM) the budget and max_tb could be raised
# (tb up to 1024) for a small extra win on very large batches.


def _vmem_bytes(tb, dim_x_pad, dim_h_pad, dout_pad, in_isize, out_isize):
    return (2 * tb * dim_x_pad * in_isize                                   # x (2 bufs)
            + 2 * tb * dout_pad * out_isize                                 # out (2 bufs)
            + 2 * (dim_x_pad * dim_h_pad + dim_h_pad * dout_pad) * in_isize  # weights
            + 2 * (dim_h_pad + dout_pad) * 4                                # biases
            + tb * (dim_h_pad + dout_pad) * 4)                              # f32 temps


def _pick_batch_tile(b_aligned, min_tb, max_tb, vmem_fn):
    """Largest min_tb-aligned tile <= max_tb with <=25% batch over-padding that
    fits the VMEM budget; capped so the grid has >=2 steps (v7x megacore) once
    the batch spans at least two minimum tiles."""
    def shrink(t):
        return max(min_tb, ((t // 2) // min_tb) * min_tb)

    tb = max(min_tb, min(max_tb, (b_aligned // min_tb) * min_tb))
    while tb > min_tb and _round_up(b_aligned, tb) - b_aligned > b_aligned // 4:
        tb = shrink(tb)
    while tb > min_tb and vmem_fn(tb) > _VMEM_BUDGET:
        tb = shrink(tb)
    if b_aligned >= 2 * min_tb:
        tb = min(tb, max(min_tb, ((b_aligned // 2) // min_tb) * min_tb))
    return tb


# ---------------------------------------------------------------------------
# Forward
# ---------------------------------------------------------------------------
@functools.partial(jax.jit, static_argnames=("dim_z",))
def encoder_forward(x, w1, b1, wh, bh, *, dim_z):
    """x: [B, dim_x] (float). w1/b1/wh/bh: padded, pre-transposed params from
    prepare_params. Returns (mu, logvar) in x's dtype."""
    result_dtype = x.dtype
    B, dim_x = x.shape
    dim_x_pad, dim_h_pad = w1.shape
    dout_pad = wh.shape[1]
    cdtype = w1.dtype
    in_isize = jnp.dtype(cdtype).itemsize
    out_isize = in_isize                      # output emitted in compute dtype

    # Adaptive, sublane-aligned batch tiling (16-row min for bf16, 8 for f32).
    min_tb = 8 * max(1, 4 // in_isize)
    b_aligned = _round_up(B, min_tb)
    vmem_fn = lambda t: _vmem_bytes(t, dim_x_pad, dim_h_pad, dout_pad,
                                    in_isize, out_isize)
    tb = _pick_batch_tile(b_aligned, min_tb, 512, vmem_fn)
    b_pad = _round_up(b_aligned, tb)
    grid = (b_pad // tb,)

    # One combined pad (batch rows + feature lanes), then one cast to the
    # matmul dtype.  Padded lanes are zero; padded rows are sliced off below.
    if (b_pad, dim_x_pad) != (B, dim_x):
        x = jnp.pad(x, ((0, b_pad - B), (0, dim_x_pad - dim_x)))
    x = x.astype(cdtype)

    # Advisory cost: real batch rows, real element sizes.
    flops = 2 * B * (dim_x_pad * dim_h_pad + dim_h_pad * dout_pad)
    bytes_accessed = (B * dim_x_pad * in_isize + B * dout_pad * out_isize
                      + (dim_x_pad * dim_h_pad + dim_h_pad * dout_pad) * in_isize
                      + (dim_h_pad + dout_pad) * 4)

    out = pl.pallas_call(
        _encoder_kernel,
        out_shape=jax.ShapeDtypeStruct((b_pad, dout_pad), cdtype),
        grid_spec=pltpu.PrefetchScalarGridSpec(
            num_scalar_prefetch=0,
            grid=grid,
            in_specs=[
                # Activations stream over the batch grid axis.
                pl.BlockSpec((tb, dim_x_pad), lambda i: (i, 0)),
                # Weights / biases: constant index map -> DMA'd once, revisited.
                pl.BlockSpec((dim_x_pad, dim_h_pad), lambda i: (0, 0)),
                pl.BlockSpec((1, dim_h_pad), lambda i: (0, 0)),
                pl.BlockSpec((dim_h_pad, dout_pad), lambda i: (0, 0)),
                pl.BlockSpec((1, dout_pad), lambda i: (0, 0)),
            ],
            out_specs=pl.BlockSpec((tb, dout_pad), lambda i: (i, 0)),
        ),
        compiler_params=pltpu.CompilerParams(
            dimension_semantics=("parallel",),      # megacore batch split (v7x)
            vmem_limit_bytes=48 * 1024 * 1024,      # <= v7x 64 MiB physical
        ),
        cost_estimate=pl.CostEstimate(
            flops=flops, transcendentals=0, bytes_accessed=bytes_accessed),
    )(x, w1, b1, wh, bh)

    mu = out[:B, :dim_z].astype(result_dtype)
    logvar = out[:B, dim_z:2 * dim_z].astype(result_dtype)
    return mu, logvar


# ---------------------------------------------------------------------------
# Init / reference / test
# ---------------------------------------------------------------------------
def init_params(key, dim_x, dim_h, dim_z, dtype=jnp.float32):
    """Deterministic init mimicking nn.Linear default (U[-1/sqrt(fan_in), +])."""
    ks = jax.random.split(key, 6)

    def lin(kw, kb, fan_in, fan_out):
        bound = 1.0 / jnp.sqrt(jnp.float32(fan_in))
        w = jax.random.uniform(kw, (fan_out, fan_in), dtype, -bound, bound)
        b = jax.random.uniform(kb, (fan_out,), dtype, -bound, bound)
        return w, b

    w_lin, b_lin = lin(ks[0], ks[1], dim_x, dim_h)
    w_mu, b_mu = lin(ks[2], ks[3], dim_h, dim_z)
    w_lv, b_lv = lin(ks[4], ks[5], dim_h, dim_z)
    return {
        "w_lin": w_lin, "b_lin": b_lin,
        "w_mu": w_mu, "b_mu": b_mu,
        "w_logvar": w_lv, "b_logvar": b_lv,
    }


def _reference(x, p):
    h = jnp.maximum(x @ p["w_lin"].T + p["b_lin"], 0.0)
    return h @ p["w_mu"].T + p["b_mu"], h @ p["w_logvar"].T + p["b_logvar"]


if __name__ == "__main__":
    B, dim_x, dim_h, dim_z = 8, 32, 64, 16

    key = jax.random.PRNGKey(0)
    kx, kp = jax.random.split(key)
    x = jax.random.normal(kx, (B, dim_x), dtype=jnp.float32)
    params = init_params(kp, dim_x, dim_h, dim_z)
    ref_mu, ref_lv = _reference(x, params)

    # f32 path: strict structural correctness check.
    p32 = prepare_params(params, dtype=jnp.float32)
    mu32, lv32 = encoder_forward(x, p32["w1"], p32["b1"], p32["wh"], p32["bh"],
                                 dim_z=p32["dim_z"])
    jax.block_until_ready((mu32, lv32))
    assert mu32.shape == (B, dim_z) and lv32.shape == (B, dim_z)
    assert jnp.allclose(mu32, ref_mu, atol=1e-5, rtol=1e-5)
    assert jnp.allclose(lv32, ref_lv, atol=1e-5, rtol=1e-5)

    # bf16 fast path (production default): full MXU rate, half the HBM bytes.
    pbf = prepare_params(params)  # dtype=jnp.bfloat16
    mu, logvar = encoder_forward(x, pbf["w1"], pbf["b1"], pbf["wh"], pbf["bh"],
                                 dim_z=pbf["dim_z"])
    jax.block_until_ready((mu, logvar))
    assert mu.shape == (B, dim_z) and logvar.shape == (B, dim_z)
    assert jnp.allclose(mu, ref_mu, atol=5e-2, rtol=5e-2)
    assert jnp.allclose(logvar, ref_lv, atol=5e-2, rtol=5e-2)

    print("KERNEL_OK")
</pallas_src>

<mosaic_0001>
module attributes {stable_mosaic.version = 11 : i64} {
  func.func @_encoder_kernel(%arg0: i32, %arg1: memref<8x128xf32, #tpu.memory_space<vmem>>, %arg2: memref<128x128xf32, #tpu.memory_space<vmem>>, %arg3: memref<1x128xf32, #tpu.memory_space<vmem>>, %arg4: memref<128x128xf32, #tpu.memory_space<vmem>>, %arg5: memref<1x128xf32, #tpu.memory_space<vmem>>, %arg6: memref<8x128xf32, #tpu.memory_space<vmem>>) attributes {dimension_semantics = [#tpu.dimension_semantics<parallel>], iteration_bounds = array<i64: 1>, scalar_prefetch = 0 : i64, scratch_operands = 0 : i64, tpu.core_type = #tpu.core_type<tc>, window_params = [{transform_indices = @transform_0, window_bounds = array<i64: 8, 128>}, {pipeline_mode = #tpu.pipeline_mode<synchronous>, transform_indices = @transform_1, window_bounds = array<i64: 128, 128>}, {pipeline_mode = #tpu.pipeline_mode<synchronous>, transform_indices = @transform_2, window_bounds = array<i64: 1, 128>}, {pipeline_mode = #tpu.pipeline_mode<synchronous>, transform_indices = @transform_3, window_bounds = array<i64: 128, 128>}, {pipeline_mode = #tpu.pipeline_mode<synchronous>, transform_indices = @transform_4, window_bounds = array<i64: 1, 128>}, {transform_indices = @transform_5, window_bounds = array<i64: 8, 128>}]} {
    %c0 = arith.constant 0 : index
    %c0_0 = arith.constant 0 : index
    %0 = vector.load %arg1[%c0, %c0_0] : memref<8x128xf32, #tpu.memory_space<vmem>>, vector<8x128xf32>
    %c0_1 = arith.constant 0 : index
    %c0_2 = arith.constant 0 : index
    %1 = vector.load %arg2[%c0_1, %c0_2] : memref<128x128xf32, #tpu.memory_space<vmem>>, vector<128x128xf32>
    %cst = arith.constant dense<0.000000e+00> : vector<8x128xf32>
    %2 = tpu.matmul %0, %1, %cst {dimension_numbers = #tpu.dot_dimension_numbers<[1], [0], [0], [1], [0, 0, 1, 1], [], []>} : vector<8x128xf32>, vector<128x128xf32>, vector<8x128xf32> -> vector<8x128xf32>
    %c0_3 = arith.constant 0 : index
    %c0_4 = arith.constant 0 : index
    %3 = vector.load %arg3[%c0_3, %c0_4] : memref<1x128xf32, #tpu.memory_space<vmem>>, vector<1x128xf32>
    %4 = vector.broadcast %3 : vector<1x128xf32> to vector<8x128xf32>
    %5 = arith.addf %2, %4 : vector<8x128xf32>
    %cst_5 = arith.constant 0.000000e+00 : f32
    %6 = vector.broadcast %cst_5 : f32 to vector<8x128xf32>
    %7 = arith.maximumf %5, %6 : vector<8x128xf32>
    %c0_6 = arith.constant 0 : index
    %c0_7 = arith.constant 0 : index
    %8 = vector.load %arg4[%c0_6, %c0_7] : memref<128x128xf32, #tpu.memory_space<vmem>>, vector<128x128xf32>
    %cst_8 = arith.constant dense<0.000000e+00> : vector<8x128xf32>
    %9 = tpu.matmul %7, %8, %cst_8 {dimension_numbers = #tpu.dot_dimension_numbers<[1], [0], [0], [1], [0, 0, 1, 1], [], []>} : vector<8x128xf32>, vector<128x128xf32>, vector<8x128xf32> -> vector<8x128xf32>
    %c0_9 = arith.constant 0 : index
    %c0_10 = arith.constant 0 : index
    %10 = vector.load %arg5[%c0_9, %c0_10] : memref<1x128xf32, #tpu.memory_space<vmem>>, vector<1x128xf32>
    %11 = vector.broadcast %10 : vector<1x128xf32> to vector<8x128xf32>
    %12 = arith.addf %9, %11 : vector<8x128xf32>
    %c0_11 = arith.constant 0 : index
    %c0_12 = arith.constant 0 : index
    %13 = vector.load %arg6[%c0_11, %c0_12] : memref<8x128xf32, #tpu.memory_space<vmem>>, vector<8x128xf32>
    tpu.vector_store %arg6[%c0_11, %c0_12], %12 {strides = array<i32>} : memref<8x128xf32, #tpu.memory_space<vmem>>, vector<8x128xf32>,
    return
  }
  func.func @transform_0(%arg0: i32) -> (i32, i32) {
    %c0_i32 = arith.constant 0 : i32
    %c0_i32_0 = arith.constant 0 : i32
    return %arg0, %c0_i32 : i32, i32
  }
  func.func @transform_1(%arg0: i32) -> (i32, i32) {
    %c0_i32 = arith.constant 0 : i32
    %c0_i32_0 = arith.constant 0 : i32
    %c0_i32_1 = arith.constant 0 : i32
    return %c0_i32, %c0_i32_0 : i32, i32
  }
  func.func @transform_2(%arg0: i32) -> (i32, i32) {
    %c0_i32 = arith.constant 0 : i32
    %c0_i32_0 = arith.constant 0 : i32
    %c0_i32_1 = arith.constant 0 : i32
    return %c0_i32, %c0_i32_0 : i32, i32
  }
  func.func @transform_3(%arg0: i32) -> (i32, i32) {
    %c0_i32 = arith.constant 0 : i32
    %c0_i32_0 = arith.constant 0 : i32
    %c0_i32_1 = arith.constant 0 : i32
    return %c0_i32, %c0_i32_0 : i32, i32
  }
  func.func @transform_4(%arg0: i32) -> (i32, i32) {
    %c0_i32 = arith.constant 0 : i32
    %c0_i32_0 = arith.constant 0 : i32
    %c0_i32_1 = arith.constant 0 : i32
    return %c0_i32, %c0_i32_0 : i32, i32
  }
  func.func @transform_5(%arg0: i32) -> (i32, i32) {
    %c0_i32 = arith.constant 0 : i32
    %c0_i32_0 = arith.constant 0 : i32
    return %arg0, %c0_i32 : i32, i32
  }
}

</mosaic_0001>

<bundles_post_ra>
// kernel: encoder_forward.1
= control target key start
LH: loop header
LB: loop body
LE: loop exit
PB: predicated region body
PF: predicated region fallthrough
CT: control target
= control target key end

     0   :  { %10 = vsyncpa [#allocation3], 0  ;;  %s541_s0 = inlined_call_operand.vmem [shape: f32[8,128], index: 0, kind: input, shape index: {}]   ;;  %s542_s1 = inlined_call_operand.hbm [shape: f32[128,128], index: 1, kind: input, shape index: {}]   ;;  %s543_s2 = inlined_call_operand.vmem [shape: f32[1,128], index: 2, kind: input, shape index: {}]   ;;  %s544_s3 = inlined_call_operand.hbm [shape: f32[128,128], index: 3, kind: input, shape index: {}]   ;;  %s545_s4 = inlined_call_operand.vmem [shape: f32[1,128], index: 4, kind: input, shape index: {}]   ;;  %s546_s5 = inlined_call_operand.vmem [shape: f32[8,128], index: 5, kind: output, shape index: {}]  }
   0x1   :  { %11 = vsyncpa [#allocation5], 0  ;;  %s452_s18 = smov [#allocation2]   ;;  %s404_s22 = scalar_lea.hbm %s542_s1, 2048 }
   0x2   :  { %s19_s19 = sshll.u32 %s452_s18, 4  ;;  %p405_p0 = scmp.ne.s32.totalorder %s542_s1, %s404_s22  ;;  %s20_s19 = int_to_ptr.vmem [resolvable:$true] %s19_s19 }
   0x3   :  { %p408_p1 = scmp.lt.u32.totalorder %s404_s22, %s542_s1 }
   0x5   :  { %p410_p2 = pnand %p408_p1, %p405_p0 }
   0x7   :  { %413 = shalt.err (!%p410_p2)
}
   0x8   :  { %s414_s27 = scalar_lea.vmem %s20_s19, 2048  ;;  %p419_p4 = scmp.lt.s32.totalorder %s20_s19, %s20_s19 }
   0x9   :  { %p415_p3 = scmp.ne.s32.totalorder %s20_s19, %s414_s27  ;;  %p420_p5 = scmp.lt.s32.totalorder %s414_s27, %s414_s27 }
   0xb   :  { %p421_p6 = por %p420_p5, %p419_p4 }
   0xd   :  { %p422_p7 = pnand %p421_p6, %p415_p3 }
   0xf   :  { %425 = shalt.err (!%p422_p7)
}
  0x10   :  { %s453_s28 = smov 128   ;;  %s454_s29 = smov 8  }
  0x11   :  { %25 = dma.hbm_to_vmem [thread:$0]  %s542_s1, 2048, %s20_s19, [#allocation3], %s453_s28, %s453_s28, %s454_s29  }
  0x12   :  { %s455_s7 = smov [#allocation4]   ;;  %s426_s11 = scalar_lea.hbm %s544_s3, 2048 }
  0x13   :  { %s33_s8 = sshll.u32 %s455_s7, 4  ;;  %p427_p8 = scmp.ne.s32.totalorder %s544_s3, %s426_s11  ;;  %s34_s8 = int_to_ptr.vmem [resolvable:$true] %s33_s8 }
  0x14   :  { %p430_p9 = scmp.lt.u32.totalorder %s426_s11, %s544_s3 }
  0x16   :  { %p432_p10 = pnand %p430_p9, %p427_p8 }
  0x18   :  { %435 = shalt.err (!%p432_p10)
}
  0x19   :  { %s436_s16 = scalar_lea.vmem %s34_s8, 2048  ;;  %p441_p12 = scmp.lt.s32.totalorder %s34_s8, %s34_s8 }
  0x1a   :  { %p437_p11 = scmp.ne.s32.totalorder %s34_s8, %s436_s16  ;;  %p442_p13 = scmp.lt.s32.totalorder %s436_s16, %s436_s16 }
  0x1c   :  { %p443_p0 = por %p442_p13, %p441_p12 }
  0x1e   :  { %p444_p1 = pnand %p443_p0, %p437_p11 }
  0x20   :  { %447 = shalt.err (!%p444_p1)
}
  0x21   :  { %39 = dma.hbm_to_vmem [thread:$0]  %s544_s3, 2048, %s34_s8, [#allocation5], %s453_s28, %s453_s28, %s454_s29  }
  0x22   :  { %448 = dma.done.wait [#allocation3], 2048  }
  0x23   :  { %449 = vsyncadd [#allocation3], 4294965248 }
  0x24   :  { %450 = dma.done.wait [#allocation5], 2048  }
  0x25   :  { %451 = vsyncadd [#allocation5], 4294965248  ;;  %v456_v0 = vmov 0.0|0.0   ;;  %vm457_vm0 = vmmov 0   ;;  %v458_v1 = vmov 0.0   ;;  %v49_v2 = vld [vmem:[#allocation2] sm:$0xff] }
  0x26   :  { %349 = vmatprep.subr.bf16.mxu0 %v456_v0  ;;  %311 = vmatprep.mubr.msk.f32.mxu0 %vm457_vm0, %v458_v1  ;;  %v50_v3 = vld [vmem:[#allocation2 + $0x8] sm:$0xff]  ;;  %v51_v4 = vld [vmem:[#allocation2 + $0x10] sm:$0xff]  ;;  %v52_v6 = vld [vmem:[#allocation2 + $0x18] sm:$0xff] }
  0x27   :  { %373 = vmatprep.subr.bf16.mxu1 %v456_v0  ;;  %346 = vmatprep.mubr.msk.f32.mxu1 %vm457_vm0, %v458_v1  ;;  %v350_v5 = vpack.c.bf16 %v50_v3, %v49_v2  ;;  %v353_v7 = vpack.c.bf16 %v52_v6, %v51_v4  ;;  %v53_v8 = vld [vmem:[#allocation2 + $0x20] sm:$0xff]  ;;  %v54_v9 = vld [vmem:[#allocation2 + $0x28] sm:$0xff]  ;;  %v145_v12 = vld [vmem:[#allocation4 + $0x10] sm:$0xff] }
  0x28   :  { %v143_v10 = vld [vmem:[#allocation4] sm:$0xff]  ;;  %v144_v11 = vld [vmem:[#allocation4 + $0x8] sm:$0xff]  ;;  %v146_v13 = vld [vmem:[#allocation4 + $0x18] sm:$0xff]  ;;  %v356_v14 = vpack.c.bf16 %v54_v9, %v53_v8 }
  0x29   :  { %351 = vmatpush3.bf16.msra.mxu0 %v350_v5  ;;  %v374_v15 = vpack.c.bf16 %v144_v11, %v143_v10  ;;  %v55_v16 = vld [vmem:[#allocation2 + $0x30] sm:$0xff]  ;;  %v56_v17 = vld [vmem:[#allocation2 + $0x38] sm:$0xff]  ;;  %v377_v18 = vpack.c.bf16 %v146_v13, %v145_v12  ;;  %v147_v19 = vld [vmem:[#allocation4 + $0x20] sm:$0xff] }
  0x2a   :  { %352 = vmatprep.subr.bf16.mxu0 %v456_v0  ;;  %v148_v20 = vld [vmem:[#allocation4 + $0x28] sm:$0xff]  ;;  %v359_v21 = vpack.c.bf16 %v56_v17, %v55_v16  ;;  %v57_v22 = vld [vmem:[#allocation2 + $0x40] sm:$0xff]  ;;  %v149_v25 = vld [vmem:[#allocation4 + $0x30] sm:$0xff] }
  0x2b   :  { %375 = vmatpush3.bf16.msra.mxu1 %v374_v15  ;;  %v58_v23 = vld [vmem:[#allocation2 + $0x48] sm:$0xff]  ;;  %v380_v24 = vpack.c.bf16 %v148_v20, %v147_v19  ;;  %v150_v26 = vld [vmem:[#allocation4 + $0x38] sm:$0xff]  ;;  %v59_v28 = vld [vmem:[#allocation2 + $0x50] sm:$0xff] }
  0x2c   :  { %376 = vmatprep.subr.bf16.mxu1 %v456_v0  ;;  %v362_v27 = vpack.c.bf16 %v58_v23, %v57_v22  ;;  %v60_v29 = vld [vmem:[#allocation2 + $0x58] sm:$0xff]  ;;  %v383_v30 = vpack.c.bf16 %v150_v26, %v149_v25  ;;  %v151_v31 = vld [vmem:[#allocation4 + $0x40] sm:$0xff]  ;;  %v152_v32 = vld [vmem:[#allocation4 + $0x48] sm:$0xff] }
  0x2d   :  { %354 = vmatpush3.bf16.msra.mxu0 %v353_v7  ;;  %v365_v33 = vpack.c.bf16 %v60_v29, %v59_v28  ;;  %v61_v34 = vld [vmem:[#allocation2 + $0x60] sm:$0xff]  ;;  %v62_v35 = vld [vmem:[#allocation2 + $0x68] sm:$0xff]  ;;  %v386_v36 = vpack.c.bf16 %v152_v32, %v151_v31  ;;  %v153_v37 = vld [vmem:[#allocation4 + $0x50] sm:$0xff] }
  0x2e   :  { %355 = vmatprep.subr.bf16.mxu0 %v456_v0  ;;  %v154_v38 = vld [vmem:[#allocation4 + $0x58] sm:$0xff]  ;;  %v368_v39 = vpack.c.bf16 %v62_v35, %v61_v34  ;;  %v63_v40 = vld [vmem:[#allocation2 + $0x70] sm:$0xff]  ;;  %v155_v43 = vld [vmem:[#allocation4 + $0x60] sm:$0xff] }
  0x2f   :  { %378 = vmatpush3.bf16.msra.mxu1 %v377_v18  ;;  %v64_v41 = vld [vmem:[#allocation2 + $0x78] sm:$0xff]  ;;  %v389_v42 = vpack.c.bf16 %v154_v38, %v153_v37  ;;  %v156_v44 = vld [vmem:[#allocation4 + $0x68] sm:$0xff]  ;;  %v48_v47 = vld [vmem:[%s541_s0] sm:$0xff] }
  0x30   :  { %379 = vmatprep.subr.bf16.mxu1 %v456_v0  ;;  %v371_v45 = vpack.c.bf16 %v64_v41, %v63_v40  ;;  %v392_v46 = vpack.c.bf16 %v156_v44, %v155_v43  ;;  %v157_v48 = vld [vmem:[#allocation4 + $0x70] sm:$0xff]  ;;  %v158_v49 = vld [vmem:[#allocation4 + $0x78] sm:$0xff]  ;;  %v243_v51 = vld [vmem:[%s543_s2] ss:$0 sm:$0xff] }
  0x31   :  { %357 = vmatpush3.bf16.msra.mxu0 %v356_v14  ;;  %v395_v50 = vpack.c.bf16 %v158_v49, %v157_v48  ;;  %v244_v56 = vld [vmem:[%s545_s4] ss:$0 sm:$0xff] }
  0x32   :  { %358 = vmatprep.subr.bf16.mxu0 %v456_v0 }
  0x33   :  { %381 = vmatpush3.bf16.msra.mxu1 %v380_v24 }
  0x34   :  { %382 = vmatprep.subr.bf16.mxu1 %v456_v0 }
  0x35   :  { %360 = vmatpush3.bf16.msra.mxu0 %v359_v21 }
  0x36   :  { %361 = vmatprep.subr.bf16.mxu0 %v456_v0 }
  0x37   :  { %384 = vmatpush3.bf16.msra.mxu1 %v383_v30 }
  0x38   :  { %385 = vmatprep.subr.bf16.mxu1 %v456_v0 }
  0x39   :  { %363 = vmatpush3.bf16.msra.mxu0 %v362_v27 }
  0x3a   :  { %364 = vmatprep.subr.bf16.mxu0 %v456_v0 }
  0x3b   :  { %387 = vmatpush3.bf16.msra.mxu1 %v386_v36 }
  0x3c   :  { %388 = vmatprep.subr.bf16.mxu1 %v456_v0 }
  0x3d   :  { %366 = vmatpush3.bf16.msra.mxu0 %v365_v33 }
  0x3e   :  { %367 = vmatprep.subr.bf16.mxu0 %v456_v0 }
  0x3f   :  { %390 = vmatpush3.bf16.msra.mxu1 %v389_v42 }
  0x40   :  { %391 = vmatprep.subr.bf16.mxu1 %v456_v0 }
  0x41   :  { %369 = vmatpush3.bf16.msra.mxu0 %v368_v39 }
  0x42   :  { %370 = vmatprep.subr.bf16.mxu0 %v456_v0 }
  0x43   :  { %393 = vmatpush3.bf16.msra.mxu1 %v392_v46 }
  0x44   :  { %394 = vmatprep.subr.bf16.mxu1 %v456_v0 }
  0x45   :  { %372 = vmatpush3.bf16.msra.mxu0 %v371_v45 }
  0x47   :  { %396 = vmatpush3.bf16.msra.mxu1 %v395_v50 }
  0x48   :  { %312 = vmatmul.mubr.f32.vlgmr.msra.gmra.mrb[0].mxu0 %v48_v47 }
 0x11b   :  { %v138_v52 = vpop.f32.mrb[0].mxu0 }
 0x11c   :  { %v139_v53 = vadd.f32 %v243_v51, %v138_v52  ;;  %v313_v54 = vpop.f32.mrb[1].mxu0 }
 0x11e   :  { %v142_v55 = vmax.f32 %v139_v53, 0.0 }
 0x120   :  { %347 = vmatmul.mubr.f32.vlgmr.msra.gmra.mrb[0].mxu1 %v142_v55 }
 0x1f3   :  { %v232_v57 = vpop.f32.mrb[0].mxu1 }
 0x1f4   :  { %v233_v58 = vadd.f32 %v244_v56, %v232_v57  ;;  %v348_v59 = vpop.f32.mrb[1].mxu1 }
 0x1f6   :  { %236 = vst [vmem:[%s546_s5] sm:$0xff] %v233_v58 }
 0x1f7   :  { %241 = vsyncpa [#allocation3], 1 }
 0x1f8   :  { %242 = vsyncpa [#allocation5], 1 }

</bundles_post_ra>
